<compile_context>
chip_gen: v6e
topology: v6e:2x2x1
jax: 0.10.0
libtpu: 0.0.40
codegen_flags: <defaults>
</compile_context>

<pallas_src>
import math
import jax
import jax.numpy as jnp
from jax import lax
from jax.experimental import pallas as pl
from jax.experimental.pallas import tpu as pltpu


# ---------------------------------------------------------------------------
# Hardware / VMEM sizing helpers
# ---------------------------------------------------------------------------

def _physical_vmem_bytes():
    """Per-core VMEM capacity; conservative 64 MiB (v7x) if query fails."""
    try:
        return int(pltpu.get_tpu_info().vmem_capacity_bytes)
    except Exception:
        return 64 * 1024 * 1024


def _vmem_limit_bytes():
    # ~48 MiB on v7x (64 MiB physical), ~96 MiB on v5e/v6e (128 MiB physical).
    return min(int(_physical_vmem_bytes() * 3 // 4), 112 * 1024 * 1024)


# One-time probe: does this Pallas build accept pipeline_mode=pl.Buffered(1)?
try:
    pl.BlockSpec((8, 128), lambda i: (i, 0), pipeline_mode=pl.Buffered(1))
    _HAS_BUFFERED = True
except Exception:  # pragma: no cover - older Pallas
    _HAS_BUFFERED = False


def _resident_spec(block_shape, index_map):
    """Single-buffered BlockSpec for blocks whose index_map is constant along
    the fast grid axis (resident data) — halves their VMEM footprint."""
    if _HAS_BUFFERED:
        return pl.BlockSpec(block_shape, index_map, pipeline_mode=pl.Buffered(1))
    return pl.BlockSpec(block_shape, index_map)


def _lane_pad(n):
    return ((n + 127) // 128) * 128


def _pick_tile_l(B, L, S, H, E, D, sp_bytes, vmem_limit, max_tl=None):
    """Largest L-tile (multiple of 8) whose working set fits the VMEM budget."""
    kv_bufs = 1 if _HAS_BUFFERED else 2
    s8 = ((S + 7) // 8) * 8
    resident = kv_bufs * H * s8 * (_lane_pad(E) + _lane_pad(D)) * 4      # K + V
    per_row = (
        2 * H * (_lane_pad(E) + _lane_pad(D) + _lane_pad(1)) * 4         # q/out/sigma (x2 buf)
        + 4 * H * _lane_pad(S) * sp_bytes                                # series+prior (x2 buf)
        + 3 * H * _lane_pad(S) * 4                                       # in-kernel f32 temps
    )
    slack = 6 * 1024 * 1024
    avail = max(vmem_limit - resident - slack, per_row * 8)
    tl = int(avail // per_row)
    tl = max(8, min(tl, L, 512))
    if max_tl is not None:
        tl = max(8, min(tl, int(max_tl)))
    if tl < L:
        tl = max(8, (tl // 8) * 8)       # (8,128) sublane alignment for blocks
    else:
        tl = L
    # v7x has 2 TensorCores: keep >= 2 grid steps along the parallel axes.
    if B * pl.cdiv(L, tl) < 2:
        half = (((L + 1) // 2) + 7) // 8 * 8
        if half < L:
            tl = half
    return tl


# ---------------------------------------------------------------------------
# Linear projection kernel (row-tiled, weight resident & single-buffered)
# ---------------------------------------------------------------------------

def _linear_kernel(x_ref, w_ref, b_ref, o_ref):
    # x: (TM, Din), w: (Din, Dout), b: (1, Dout)  -> o: (TM, Dout)
    o_ref[...] = (
        jnp.dot(x_ref[...], w_ref[...], preferred_element_type=jnp.float32)
        + b_ref[...]
    )


def pallas_linear(x2d, w, b, tm=512):
    """y = x2d @ w + b, tiled over rows; w/b stay resident in VMEM."""
    N, Din = x2d.shape
    Dout = w.shape[1]
    vmem_limit = _vmem_limit_bytes()
    w_bufs = 1 if _HAS_BUFFERED else 2
    budget = vmem_limit - w_bufs * Din * _lane_pad(Dout) * 4 - (2 << 20)
    per_row = 2 * (_lane_pad(Din) + _lane_pad(Dout)) * 4
    tm = min(tm, N, max(8, budget // per_row))
    if tm < N:
        tm = max(8, (tm // 8) * 8)
    else:
        tm = N
    grid = (pl.cdiv(N, tm),)
    return pl.pallas_call(
        _linear_kernel,
        out_shape=jax.ShapeDtypeStruct((N, Dout), jnp.float32),
        grid_spec=pltpu.PrefetchScalarGridSpec(
            num_scalar_prefetch=0,
            grid=grid,
            in_specs=[
                pl.BlockSpec((tm, Din), lambda i: (i, 0)),
                _resident_spec((Din, Dout), lambda i: (0, 0)),   # resident
                _resident_spec((1, Dout), lambda i: (0, 0)),     # resident
            ],
            out_specs=pl.BlockSpec((tm, Dout), lambda i: (i, 0)),
        ),
        compiler_params=pltpu.CompilerParams(
            dimension_semantics=("parallel",),
            vmem_limit_bytes=vmem_limit,
        ),
    )(x2d, w, b.reshape(1, Dout))


# ---------------------------------------------------------------------------
# Fused q + sigma projection: one x read, two lane-dense outputs
# ---------------------------------------------------------------------------

def _qsigma_kernel(x_ref, wq_ref, bq_ref, ws_ref, bs_ref, q_ref, s_ref):
    x = x_ref[...]
    q_ref[...] = (jnp.dot(x, wq_ref[...], preferred_element_type=jnp.float32)
                  + bq_ref[...])
    s_ref[...] = (jnp.dot(x, ws_ref[...], preferred_element_type=jnp.float32)
                  + bs_ref[...])


def pallas_q_sigma(x2d, wq, bq, ws, bs, tm=512):
    """(q, sigma_raw) from one pass over x; q output stays lane-dense."""
    N, Din = x2d.shape
    Dq, Ds = wq.shape[1], ws.shape[1]
    vmem_limit = _vmem_limit_bytes()
    w_bufs = 1 if _HAS_BUFFERED else 2
    budget = (vmem_limit
              - w_bufs * Din * (_lane_pad(Dq) + _lane_pad(Ds)) * 4 - (2 << 20))
    per_row = 2 * (_lane_pad(Din) + _lane_pad(Dq) + _lane_pad(Ds)) * 4
    tm = min(tm, N, max(8, budget // per_row))
    if tm < N:
        tm = max(8, (tm // 8) * 8)
    else:
        tm = N
    grid = (pl.cdiv(N, tm),)
    return pl.pallas_call(
        _qsigma_kernel,
        out_shape=(jax.ShapeDtypeStruct((N, Dq), jnp.float32),
                   jax.ShapeDtypeStruct((N, Ds), jnp.float32)),
        grid_spec=pltpu.PrefetchScalarGridSpec(
            num_scalar_prefetch=0,
            grid=grid,
            in_specs=[
                pl.BlockSpec((tm, Din), lambda i: (i, 0)),
                _resident_spec((Din, Dq), lambda i: (0, 0)),
                _resident_spec((1, Dq), lambda i: (0, 0)),
                _resident_spec((Din, Ds), lambda i: (0, 0)),
                _resident_spec((1, Ds), lambda i: (0, 0)),
            ],
            out_specs=[
                pl.BlockSpec((tm, Dq), lambda i: (i, 0)),
                pl.BlockSpec((tm, Ds), lambda i: (i, 0)),
            ],
        ),
        compiler_params=pltpu.CompilerParams(
            dimension_semantics=("parallel",),
            vmem_limit_bytes=vmem_limit,
        ),
    )(x2d, wq, bq.reshape(1, Dq), ws, bs.reshape(1, Ds))


# ---------------------------------------------------------------------------
# Anomaly attention kernel (all heads per step, L tiled, K/V resident)
# ---------------------------------------------------------------------------

def _anomaly_attn_kernel(q_ref, k_ref, v_ref, sig_ref,
                         out_ref, series_ref, prior_ref):
    # q: (H, TL, E), k: (H, S, E), v: (H, S, D), sig: (H, TL, 1) (transformed)
    H, TL, E = q_ref.shape
    S = k_ref.shape[1]

    scale = 1.0 / math.sqrt(E)
    q = q_ref[...] * scale                      # fold scale into the small side
    k = k_ref[...]
    v = v_ref[...]

    # scores: contract last dims directly (batched over heads) -> (H, TL, S)
    scores = lax.dot_general(
        q, k, (((2,), (2,)), ((0,), (0,))),
        preferred_element_type=jnp.float32)

    # numerically-stable softmax; EXACT reciprocal (series is a returned
    # tensor consumed by the association-discrepancy / KL computation).
    m = jnp.max(scores, axis=-1, keepdims=True)
    e = jnp.exp(scores - m)
    denom = jnp.sum(e, axis=-1, keepdims=True)              # (H, TL, 1)
    series = e * pl.reciprocal(denom)

    # Gaussian prior from learned sigma (sigma already transformed in wrapper).
    sig = sig_ref[...]                                       # (H, TL, 1)
    inv_sig = pl.reciprocal(sig)                             # exact 1/sigma
    coef = inv_sig * (1.0 / math.sqrt(2.0 * math.pi))        # (H, TL, 1)
    neg_half_inv2 = -0.5 * inv_sig * inv_sig                 # (H, TL, 1)

    # |i-j|^2 generated in-kernel (VPU iota; no HBM traffic / extra buffer)
    base = (pl.program_id(1) * TL).astype(jnp.float32)
    row = lax.broadcasted_iota(jnp.float32, (TL, S), 0) + base
    col = lax.broadcasted_iota(jnp.float32, (TL, S), 1)
    diff = row - col
    dist2 = diff * diff                                      # (TL, S)

    prior = coef * jnp.exp(dist2[None, :, :] * neg_half_inv2)   # (H, TL, S)

    out_ref[...] = lax.dot_general(
        series, v, (((2,), (1,)), ((0,), (0,))),
        preferred_element_type=jnp.float32)                  # (H, TL, D)
    series_ref[...] = series.astype(series_ref.dtype)
    prior_ref[...] = prior.astype(prior_ref.dtype)


def pallas_anomaly_attention(q_bhle, k_bhse, v_bhsd, sigma_bhl1,
                             series_prior_dtype=jnp.float32, max_tl=None):
    """q:(B,H,L,E) k:(B,H,S,E) v:(B,H,S,D) sigma(transformed):(B,H,L,1).

    series_prior_dtype=jnp.bfloat16 halves the dominant HBM writeback (biggest
    relative win on v5e/v6e); default f32 preserves the module's numerics.
    """
    B, H, L, E = q_bhle.shape
    S = k_bhse.shape[2]
    D = v_bhsd.shape[3]
    sp_bytes = jnp.dtype(series_prior_dtype).itemsize

    vmem_limit = _vmem_limit_bytes()
    tl = _pick_tile_l(B, L, S, H, E, D, sp_bytes, vmem_limit, max_tl=max_tl)
    grid = (B, pl.cdiv(L, tl))

    out_shapes = (
        jax.ShapeDtypeStruct((B, H, L, D), jnp.float32),           # out
        jax.ShapeDtypeStruct((B, H, L, S), series_prior_dtype),    # series
        jax.ShapeDtypeStruct((B, H, L, S), series_prior_dtype),    # prior
    )

    def l_map(b, lt):   # q / sigma / outputs follow the L tile
        return (b, 0, lt, 0)

    def kv_map(b, lt):  # K/V stay resident across L tiles of the same batch
        return (b, 0, 0, 0)

    cost = pl.CostEstimate(
        flops=int(2 * B * H * L * S * (E + D)),
        transcendentals=int(2 * B * H * L * S),
        bytes_accessed=int(4 * (B * H * L * (E + 1 + D) + B * H * S * (E + D))
                           + 2 * B * H * L * S * sp_bytes),
    )

    return pl.pallas_call(
        _anomaly_attn_kernel,
        out_shape=out_shapes,
        grid_spec=pltpu.PrefetchScalarGridSpec(
            num_scalar_prefetch=0,
            grid=grid,
            in_specs=[
                pl.BlockSpec((None, H, tl, E), l_map),             # q
                _resident_spec((None, H, S, E), kv_map),           # k (resident)
                _resident_spec((None, H, S, D), kv_map),           # v (resident)
                pl.BlockSpec((None, H, tl, 1), l_map),             # sigma
            ],
            out_specs=[
                pl.BlockSpec((None, H, tl, D), l_map),
                pl.BlockSpec((None, H, tl, S), l_map),
                pl.BlockSpec((None, H, tl, S), l_map),
            ],
        ),
        compiler_params=pltpu.CompilerParams(
            dimension_semantics=("parallel", "parallel"),
            vmem_limit_bytes=vmem_limit,
        ),
        cost_estimate=cost,
    )(q_bhle, k_bhse, v_bhsd, sigma_bhl1)


# ---------------------------------------------------------------------------
# AttentionLayer wrapper (parameter setup + glue in plain JAX)
# ---------------------------------------------------------------------------

def init_params(key, d_model, n_heads, d_keys=None, d_values=None):
    d_keys = d_keys or d_model // n_heads
    d_values = d_values or d_model // n_heads
    ks = jax.random.split(key, 10)
    s = 0.05

    def lin(kw, kb, din, dout):
        w = jax.random.normal(kw, (din, dout), jnp.float32) * s
        b = jax.random.normal(kb, (dout,), jnp.float32) * s
        return w, b

    return {
        "q": lin(ks[0], ks[1], d_model, d_keys * n_heads),
        "k": lin(ks[2], ks[3], d_model, d_keys * n_heads),
        "v": lin(ks[4], ks[5], d_model, d_values * n_heads),
        "sigma": lin(ks[6], ks[7], d_model, n_heads),
        "out": lin(ks[8], ks[9], d_values * n_heads, d_model),
        "n_heads": n_heads,
        "d_keys": d_keys,
        "d_values": d_values,
        "d_model": d_model,
    }


def attention_layer_forward(params, queries, keys, values, attn_mask=None,
                            series_prior_dtype=jnp.float32, max_attn_tile=None):
    # attn_mask is accepted but ignored (matches AnomalyAttention's behavior).
    B, L, d_model = queries.shape
    _, S, _ = keys.shape
    H = params["n_heads"]
    dk = params["d_keys"]
    dv = params["d_values"]

    # ---- fused q + sigma projection: one x read, two lane-dense outputs ----
    x2d = queries.reshape(B * L, d_model)
    q2d, sigma2d = pallas_q_sigma(x2d, params["q"][0], params["q"][1],
                                  params["sigma"][0], params["sigma"][1])
    q = q2d.reshape(B, L, H, dk)
    sigma_raw = sigma2d.reshape(B, L, H)

    k = pallas_linear(keys.reshape(B * S, d_model), *params["k"]).reshape(B, S, H, dk)
    v = pallas_linear(values.reshape(B * S, d_model), *params["v"]).reshape(B, S, H, dv)

    # TODO(synk): fold these head-major relayouts into the projection/attention
    # BlockSpecs (write head-major directly) to save ~4 small HBM passes.
    q_bh = jnp.transpose(q, (0, 2, 1, 3))
    k_bh = jnp.transpose(k, (0, 2, 1, 3))
    v_bh = jnp.transpose(v, (0, 2, 1, 3))

    # sigma transform (tiny (B,L,H) op) done once in the wrapper; the kernel
    # consumes the transformed value.
    sig_t = jnp.power(3.0, jax.nn.sigmoid(sigma_raw * 5.0) + 1e-5) - 1.0  # (B,L,H)
    sig_bh = jnp.transpose(sig_t, (0, 2, 1))                              # (B,H,L)

    out_bh, series, prior = pallas_anomaly_attention(
        q_bh, k_bh, v_bh, sig_bh[..., None],
        series_prior_dtype=series_prior_dtype, max_tl=max_attn_tile)

    # TODO(synk): if the calling contract can accept a (B,H,L,1) sigma, drop
    # this materialized broadcast (saves one series-sized HBM write).
    sigma_out = jnp.broadcast_to(sig_bh[..., None], (B, H, L, S))

    # out: (B, H, L, D) -> (B, L, H*D) -> final projection
    out = jnp.transpose(out_bh, (0, 2, 1, 3)).reshape(B * L, H * dv)
    out = pallas_linear(out, *params["out"]).reshape(B, L, d_model)

    return out, series, prior, sigma_out


# ---------------------------------------------------------------------------
# Pure-JAX reference (for correctness check)
# ---------------------------------------------------------------------------

def reference_forward(params, queries, keys, values):
    B, L, d_model = queries.shape
    _, S, _ = keys.shape
    H, dk, dv = params["n_heads"], params["d_keys"], params["d_values"]

    def lin(x, wb):
        return x @ wb[0] + wb[1]

    q = lin(queries, params["q"]).reshape(B, L, H, dk)
    k = lin(keys, params["k"]).reshape(B, S, H, dk)
    v = lin(values, params["v"]).reshape(B, S, H, dv)
    sigma = lin(queries, params["sigma"]).reshape(B, L, H)

    scale = 1.0 / math.sqrt(dk)
    scores = jnp.einsum("blhe,bshe->bhls", q, k)
    attn = scale * scores
    sig = jnp.transpose(sigma, (0, 2, 1))                       # (B, H, L)
    sig = jax.nn.sigmoid(sig * 5.0) + 1e-5
    sig = jnp.power(3.0, sig) - 1.0
    sig = jnp.broadcast_to(sig[..., None], attn.shape)
    idx = jnp.arange(L, dtype=jnp.float32)
    dist = jnp.abs(idx[:, None] - jnp.arange(S, dtype=jnp.float32)[None, :])
    prior = (1.0 / (jnp.sqrt(2.0 * jnp.pi) * sig)
             * jnp.exp(-(dist[None, None] ** 2) / 2.0 / (sig ** 2)))
    series = jax.nn.softmax(attn, axis=-1)
    out = jnp.einsum("bhls,bshd->blhd", series, v).reshape(B, L, H * dv)
    out = lin(out, params["out"])
    return out, series, prior, sig


# ---------------------------------------------------------------------------
# main
# ---------------------------------------------------------------------------

if __name__ == "__main__":
    def run_case(B, L, d_model, n_heads, seed, max_attn_tile=None):
        key = jax.random.PRNGKey(seed)
        kp, kq, kk, kv = jax.random.split(key, 4)
        params = init_params(kp, d_model, n_heads)
        queries = jax.random.normal(kq, (B, L, d_model), jnp.float32)
        keys = jax.random.normal(kk, (B, L, d_model), jnp.float32)
        values = jax.random.normal(kv, (B, L, d_model), jnp.float32)

        outs = attention_layer_forward(params, queries, keys, values,
                                       attn_mask=None,
                                       max_attn_tile=max_attn_tile)
        jax.block_until_ready(outs)

        refs = reference_forward(params, queries, keys, values)
        for name, a, b in zip(("out", "series", "prior", "sigma"), outs, refs):
            assert jnp.allclose(a, b, rtol=2e-3, atol=2e-3), f"mismatch: {name}"

    # small sanity case (single tile everywhere)
    run_case(B=2, L=8, d_model=32, n_heads=4, seed=0)
    # tiled case: multi-tile L axis + padded last tile (200 = 3*64 + 8)
    run_case(B=2, L=200, d_model=64, n_heads=4, seed=1, max_attn_tile=64)

    print("KERNEL_OK")
</pallas_src>

<mosaic_0001>
module attributes {stable_mosaic.version = 11 : i64} {
  func.func @_qsigma_kernel(%arg0: i32, %arg1: memref<16x32xf32, #tpu.memory_space<vmem>>, %arg2: memref<32x32xf32, #tpu.memory_space<vmem>>, %arg3: memref<1x32xf32, #tpu.memory_space<vmem>>, %arg4: memref<32x4xf32, #tpu.memory_space<vmem>>, %arg5: memref<1x4xf32, #tpu.memory_space<vmem>>, %arg6: memref<16x32xf32, #tpu.memory_space<vmem>>, %arg7: memref<16x4xf32, #tpu.memory_space<vmem>>) attributes {dimension_semantics = [#tpu.dimension_semantics<parallel>], iteration_bounds = array<i64: 1>, scalar_prefetch = 0 : i64, scratch_operands = 0 : i64, tpu.core_type = #tpu.core_type<tc>, window_params = [{transform_indices = @transform_0, window_bounds = array<i64: 16, 32>}, {pipeline_mode = #tpu.pipeline_mode<synchronous>, transform_indices = @transform_1, window_bounds = array<i64: 32, 32>}, {pipeline_mode = #tpu.pipeline_mode<synchronous>, transform_indices = @transform_2, window_bounds = array<i64: 1, 32>}, {pipeline_mode = #tpu.pipeline_mode<synchronous>, transform_indices = @transform_3, window_bounds = array<i64: 32, 4>}, {pipeline_mode = #tpu.pipeline_mode<synchronous>, transform_indices = @transform_4, window_bounds = array<i64: 1, 4>}, {transform_indices = @transform_5, window_bounds = array<i64: 16, 32>}, {transform_indices = @transform_6, window_bounds = array<i64: 16, 4>}]} {
    %c0 = arith.constant 0 : index
    %c0_0 = arith.constant 0 : index
    %0 = vector.load %arg1[%c0, %c0_0] : memref<16x32xf32, #tpu.memory_space<vmem>>, vector<16x32xf32>
    %c0_1 = arith.constant 0 : index
    %c0_2 = arith.constant 0 : index
    %1 = vector.load %arg2[%c0_1, %c0_2] : memref<32x32xf32, #tpu.memory_space<vmem>>, vector<32x32xf32>
    %cst = arith.constant dense<0.000000e+00> : vector<16x32xf32>
    %2 = tpu.matmul %0, %1, %cst {dimension_numbers = #tpu.dot_dimension_numbers<[1], [0], [0], [1], [0, 0, 1, 1], [], []>} : vector<16x32xf32>, vector<32x32xf32>, vector<16x32xf32> -> vector<16x32xf32>
    %c0_3 = arith.constant 0 : index
    %c0_4 = arith.constant 0 : index
    %3 = vector.load %arg3[%c0_3, %c0_4] : memref<1x32xf32, #tpu.memory_space<vmem>>, vector<1x32xf32>
    %4 = vector.broadcast %3 : vector<1x32xf32> to vector<16x32xf32>
    %5 = arith.addf %2, %4 : vector<16x32xf32>
    %c0_5 = arith.constant 0 : index
    %c0_6 = arith.constant 0 : index
    %6 = vector.load %arg6[%c0_5, %c0_6] : memref<16x32xf32, #tpu.memory_space<vmem>>, vector<16x32xf32>
    tpu.vector_store %arg6[%c0_5, %c0_6], %5 {strides = array<i32>} : memref<16x32xf32, #tpu.memory_space<vmem>>, vector<16x32xf32>,
    %c0_7 = arith.constant 0 : index
    %c0_8 = arith.constant 0 : index
    %7 = vector.load %arg4[%c0_7, %c0_8] : memref<32x4xf32, #tpu.memory_space<vmem>>, vector<32x4xf32>
    %cst_9 = arith.constant dense<0.000000e+00> : vector<16x4xf32>
    %8 = tpu.matmul %0, %7, %cst_9 {dimension_numbers = #tpu.dot_dimension_numbers<[1], [0], [0], [1], [0, 0, 1, 1], [], []>} : vector<16x32xf32>, vector<32x4xf32>, vector<16x4xf32> -> vector<16x4xf32>
    %c0_10 = arith.constant 0 : index
    %c0_11 = arith.constant 0 : index
    %9 = vector.load %arg5[%c0_10, %c0_11] : memref<1x4xf32, #tpu.memory_space<vmem>>, vector<1x4xf32>
    %10 = vector.broadcast %9 : vector<1x4xf32> to vector<16x4xf32>
    %11 = arith.addf %8, %10 : vector<16x4xf32>
    %c0_12 = arith.constant 0 : index
    %c0_13 = arith.constant 0 : index
    %12 = vector.load %arg7[%c0_12, %c0_13] : memref<16x4xf32, #tpu.memory_space<vmem>>, vector<16x4xf32>
    tpu.vector_store %arg7[%c0_12, %c0_13], %11 {strides = array<i32>} : memref<16x4xf32, #tpu.memory_space<vmem>>, vector<16x4xf32>,
    return
  }
  func.func @transform_0(%arg0: i32) -> (i32, i32) {
    %c0_i32 = arith.constant 0 : i32
    %c0_i32_0 = arith.constant 0 : i32
    return %arg0, %c0_i32 : i32, i32
  }
  func.func @transform_1(%arg0: i32) -> (i32, i32) {
    %c0_i32 = arith.constant 0 : i32
    %c0_i32_0 = arith.constant 0 : i32
    %c0_i32_1 = arith.constant 0 : i32
    return %c0_i32, %c0_i32_0 : i32, i32
  }
  func.func @transform_2(%arg0: i32) -> (i32, i32) {
    %c0_i32 = arith.constant 0 : i32
    %c0_i32_0 = arith.constant 0 : i32
    %c0_i32_1 = arith.constant 0 : i32
    return %c0_i32, %c0_i32_0 : i32, i32
  }
  func.func @transform_3(%arg0: i32) -> (i32, i32) {
    %c0_i32 = arith.constant 0 : i32
    %c0_i32_0 = arith.constant 0 : i32
    %c0_i32_1 = arith.constant 0 : i32
    return %c0_i32, %c0_i32_0 : i32, i32
  }
  func.func @transform_4(%arg0: i32) -> (i32, i32) {
    %c0_i32 = arith.constant 0 : i32
    %c0_i32_0 = arith.constant 0 : i32
    %c0_i32_1 = arith.constant 0 : i32
    return %c0_i32, %c0_i32_0 : i32, i32
  }
  func.func @transform_5(%arg0: i32) -> (i32, i32) {
    %c0_i32 = arith.constant 0 : i32
    %c0_i32_0 = arith.constant 0 : i32
    return %arg0, %c0_i32 : i32, i32
  }
  func.func @transform_6(%arg0: i32) -> (i32, i32) {
    %c0_i32 = arith.constant 0 : i32
    %c0_i32_0 = arith.constant 0 : i32
    return %arg0, %c0_i32 : i32, i32
  }
}

</mosaic_0001>

<bundles_post_ra>
// kernel: tpu_custom_call.1
= control target key start
LH: loop header
LB: loop body
LE: loop exit
PB: predicated region body
PF: predicated region fallthrough
CT: control target
= control target key end

     0   :  { %12 = vsyncpa [#allocation3], 0  ;;  %s425_s0 = inlined_call_operand.hbm [shape: f32[16,32], index: 0, kind: input, shape index: {}]   ;;  %s426_s1 = inlined_call_operand.vmem [shape: f32[32,32], index: 1, kind: input, shape index: {}]   ;;  %s427_s2 = inlined_call_operand.vmem [shape: f32[1,32], index: 2, kind: input, shape index: {}]   ;;  %s428_s3 = inlined_call_operand.vmem [shape: f32[32,4], index: 3, kind: input, shape index: {}]   ;;  %s429_s4 = inlined_call_operand.vmem [shape: f32[1,4], index: 4, kind: input, shape index: {}]   ;;  %s430_s5 = inlined_call_operand.hbm [shape: f32[16,32], index: 5, kind: output, shape index: {0}]   ;;  %s431_s6 = inlined_call_operand.vmem [shape: f32[16,4], index: 6, kind: output, shape index: {1}]  }
   0x1   :  { %13 = vsyncpa [#allocation4], 0  ;;  %s332_s21 = smov [#allocation2]  }
   0x2   :  { %s19_s22 = sshll.u32 %s332_s21, 4  ;;  %s20_s22 = int_to_ptr.vmem [resolvable:$true] %s19_s22 }
   0x3   :  { %s296_s23 = scalar_lea.vmem %s20_s22, 256  ;;  %p301_p1 = scmp.lt.s32.totalorder %s20_s22, %s20_s22 }
   0x4   :  { %p297_p0 = scmp.ne.s32.totalorder %s20_s22, %s296_s23  ;;  %p302_p2 = scmp.lt.s32.totalorder %s296_s23, %s296_s23 }
   0x6   :  { %p303_p3 = por %p302_p2, %p301_p1 }
   0x8   :  { %p304_p4 = pnand %p303_p3, %p297_p0 }
   0xa   :  { %307 = shalt.err (!%p304_p4)
}
   0xb   :  { %s333_s24 = smov 128   ;;  %s334_s25 = smov 8  }
   0xc   :  { %25 = dma.hbm_to_vmem [thread:$0]  %s425_s0, 256, %s20_s22, [#allocation3], %s333_s24, %s333_s24, %s334_s25  }
   0xd   :  { %328 = dma.done.wait [#allocation3], 256  }
   0xe   :  { %329 = vsyncadd [#allocation3], 4294967040  ;;  %v42_v0 = vld [vmem:[%s426_s1 + $0x18] sm:$0xff]  ;;  %v41_v2 = vld [vmem:[%s426_s1 + $0x10] sm:$0xff]  ;;  %vm50_vm0 = vcmask 261120   ;;  %vm220_vm1 = vcmask 31744  }
   0xf   :  { %v137_v1 = vld [vmem:[%s428_s3 + $0x18] sm:$0xff]  ;;  %262 = vmatprep.subr.mxu0 %v42_v0  ;;  %v136_v3 = vld [vmem:[%s428_s3 + $0x10] sm:$0xff]  ;;  %v40_v4 = vld [vmem:[%s426_s1 + $0x8] sm:$0xff]  ;;  %s335_s21 = smov [#allocation5]  }
  0x10   :  { %273 = vmatprep.subr.mxu1 %v137_v1  ;;  %263 = vmatpush3.msra.mxu0 %v42_v0  ;;  %v135_v5 = vld [vmem:[%s428_s3 + $0x8] sm:$0xff]  ;;  %v39_v6 = vld [vmem:[%s426_s1] sm:$0xff]  ;;  %s228_s22 = sshll.u32 %s335_s21, 4  ;;  %s229_s22 = int_to_ptr.vmem [resolvable:$true] %s228_s22 }
  0x11   :  { %274 = vmatpush3.msra.mxu1 %v137_v1  ;;  %264 = vmatprep.subr.mxu0 %v41_v2  ;;  %v134_v7 = vld [vmem:[%s428_s3] sm:$0xff]  ;;  %v38_v9 = vld [vmem:[#allocation2 + $0x8] sm:$0xff]  ;;  %s308_s27 = scalar_lea.vmem %s229_s22, 256  ;;  %p313_p6 = scmp.lt.s32.totalorder %s229_s22, %s229_s22 }
  0x12   :  { %275 = vmatprep.subr.mxu1 %v136_v3  ;;  %265 = vmatpush3.msra.mxu0 %v41_v2  ;;  %v37_v8 = vld [vmem:[#allocation2] sm:$0xff]  ;;  %p309_p5 = scmp.ne.s32.totalorder %s229_s22, %s308_s27  ;;  %p314_p7 = scmp.lt.s32.totalorder %s308_s27, %s308_s27 }
  0x13   :  { %276 = vmatpush3.msra.mxu1 %v136_v3  ;;  %266 = vmatprep.subr.mxu0 %v40_v4  ;;  %v244_v10 = vld [vmem:[%s427_s2] ss:$0 sm:$0xff] }
  0x14   :  { %277 = vmatprep.subr.mxu1 %v135_v5  ;;  %267 = vmatpush3.msra.mxu0 %v40_v4  ;;  %v247_v11 = vld [vmem:[%s429_s4] ss:$0 sm:$0xff]  ;;  %p315_p8 = por %p314_p7, %p313_p6 }
  0x15   :  { %278 = vmatpush3.msra.mxu1 %v135_v5  ;;  %268 = vmatprep.subr.mxu0 %v39_v6 }
  0x16   :  { %279 = vmatprep.subr.mxu1 %v134_v7  ;;  %269 = vmatpush3.msra.mxu0 %v39_v6  ;;  %p316_p9 = pnand %p315_p8, %p309_p5 }
  0x17   :  { %270 = vmatprep.mubr.msk.f32.mxu0 %vm50_vm0, %v37_v8  ;;  %280 = vmatpush3.msra.mxu1 %v134_v7 }
  0x18   :  { %281 = vmatprep.mubr.msk.f32.mxu1 %vm50_vm0, %v37_v8  ;;  %271 = vmatmul.mubr.msk.f32.vlgmr.msra.gmra.mxu0 %vm50_vm0, %v38_v9 }
  0x19   :  { %282 = vmatmul.mubr.msk.f32.vlgmr.msra.gmra.mxu1 %vm50_vm0, %v38_v9 }
  0xd8   :  { %v272_v12 = vpop.f32.mrf.mxu0 }
  0xd9   :  { %v283_v13 = vpop.f32.mrf.mxu1  ;;  %v129_v14 = vadd.f32 %v272_v12, %v244_v10 }
  0xda   :  { %v217_v15 = vadd.f32 %v283_v13, %v247_v11  ;;  %v123_v16 = vpop.f32.mrf.mxu0 }
  0xdb   :  { %v211_v17 = vpop.f32.mrf.mxu1  ;;  %133 = vst.msk [vmem:[#allocation5 + $0x8] sm:$0xff] %vm50_vm0, %v129_v14  ;;  %v124_v18 = vadd.f32 %v244_v10, %v123_v16 }
  0xdc   :  { %222 = vst.msk [vmem:[%s431_s6 + $0x8] sm:$0xff] %vm220_vm1, %v217_v15  ;;  %v212_v19 = vadd.f32 %v247_v11, %v211_v17 }
  0xdd   :  { %132 = vst.msk [vmem:[#allocation5] sm:$0xff] %vm50_vm0, %v124_v18 }
  0xde   :  { %221 = vst.msk [vmem:[%s431_s6] sm:$0xff] %vm220_vm1, %v212_v19 }
  0xdf   :  { %319 = shalt.err (!%p316_p9)
}
  0xe0   :  { %234 = dma.vmem_to_hbm [thread:$0]  %s229_s22, 256, %s430_s5, [#allocation4], %s333_s24, %s333_s24, %s334_s25  }
  0xe1   :  { %330 = dma.done.wait [#allocation4], 256  }
  0xe2   :  { %331 = vsyncadd [#allocation4], 4294967040 }
  0xe3   :  { %242 = vsyncpa [#allocation3], 1 }
  0xe4   :  { %243 = vsyncpa [#allocation4], 1 }

</bundles_post_ra>
